<compile_context>
chip_gen: v7x
topology: tpu7x:2x2x1
jax: 0.10.0
libtpu: 0.0.40
codegen_flags: <defaults>
</compile_context>

<pallas_src>
import functools

import jax
import jax.numpy as jnp
from jax import lax
from jax.experimental import pallas as pl
from jax.experimental.pallas import tpu as pltpu


def _pick_tile(total, cap, align=8):
    """Largest align*2^k tile (<= cap) dividing `total`; falls back to the full
    extent (always a legal block since it equals the array dim)."""
    best = None
    t = align
    while t <= min(cap, total):
        if total % t == 0:
            best = t
        t *= 2
    return best if best is not None else total


# --------------------------------------------------------------------------
# Kernel 1: normalize rows, fold 1/sqrt(T), emit stacked bf16 Z + f32 pos.
# --------------------------------------------------------------------------
def _prep_kernel(xi_ref, xj_ref, z_ref, pos_ref, *, inv_sqrt_t):
    xi = xi_ref[...].astype(jnp.float32)
    xj = xj_ref[...].astype(jnp.float32)
    # F.normalize(dim=1): x * rsqrt(max(||x||^2, 1e-24))  (== PyTorch 1e-12 norm clamp)
    zi = xi * (lax.rsqrt(jnp.maximum(jnp.sum(xi * xi, axis=1, keepdims=True),
                                     1e-24)) * inv_sqrt_t)
    zj = xj * (lax.rsqrt(jnp.maximum(jnp.sum(xj * xj, axis=1, keepdims=True),
                                     1e-24)) * inv_sqrt_t)
    # positive-pair logit sim(i, i+N)/T, computed in f32 before the bf16 cast
    p = jnp.sum(zi * zj, axis=1, keepdims=True)
    z_ref[0] = zi.astype(z_ref.dtype)
    z_ref[1] = zj.astype(z_ref.dtype)
    pos_ref[0] = p          # rows 0..N-1   (z_i block)
    pos_ref[1] = p          # rows N..2N-1  (z_j block, symmetric logit)


# --------------------------------------------------------------------------
# Kernel 2: tiled NT-Xent per-row loss.
#   grid = (row tiles [parallel], column tiles [arbitrary / reduction])
# --------------------------------------------------------------------------
def _loss_kernel(z_rows_ref, z_cols_ref, pos_ref, out_ref, acc_ref, *, inv_t):
    j = pl.program_id(1)

    @pl.when(j == 0)
    def _init():
        acc_ref[...] = jnp.zeros_like(acc_ref)

    # s = Z_rows @ Z_cols^T == sim/T (1/sqrt(T) folded into Z); bf16 in, f32 out,
    # contracting dims ((1,),(1,)) so no transposed copy is materialized.
    s = lax.dot_general(
        z_rows_ref[...], z_cols_ref[...],
        (((1,), (1,)), ((), ())),
        preferred_element_type=jnp.float32,
    )  # (tm, tn) f32
    # 1/T is the exact per-row LSE shift (||z_i||^2/T == 1/T), so exp never overflows.
    acc_ref[...] += jnp.sum(jnp.exp(s - inv_t), axis=1, keepdims=True)

    @pl.when(j == pl.num_programs(1) - 1)
    def _finalize():
        # self term k == i contributes exp(0) == 1 to the shifted sum; remove it,
        # clamped so degenerate cases cannot feed log a non-positive value.
        denom_shifted = jnp.maximum(acc_ref[...] - 1.0, 1e-30)
        out_ref[...] = inv_t + jnp.log(denom_shifted) - pos_ref[...]


@functools.partial(jax.jit, static_argnames=("temperature",))
def contrastive_loss(emb_i, emb_j, temperature=0.5):
    n, d = emb_i.shape
    assert emb_j.shape == (n, d)
    emb_i = emb_i.astype(jnp.float32)
    emb_j = emb_j.astype(jnp.float32)
    inv_t = float(1.0 / float(temperature))
    inv_sqrt_t = float(float(temperature) ** -0.5)

    # ---- kernel 1: normalize + fold temperature + positive-pair logits ------
    tr_cap = max(16, min(2048, (2 * 1024 * 1024) // max(4 * d, 1)))  # ~2 MiB f32 blocks
    tr = _pick_tile(n, tr_cap, align=16)
    z_stacked, pos_stacked = pl.pallas_call(
        functools.partial(_prep_kernel, inv_sqrt_t=inv_sqrt_t),
        grid=(n // tr,),
        in_specs=[
            pl.BlockSpec((tr, d), lambda i: (i, 0)),
            pl.BlockSpec((tr, d), lambda i: (i, 0)),
        ],
        out_specs=[
            pl.BlockSpec((2, tr, d), lambda i: (0, i, 0)),
            pl.BlockSpec((2, tr, 1), lambda i: (0, i, 0)),
        ],
        out_shape=[
            jax.ShapeDtypeStruct((2, n, d), jnp.bfloat16),
            jax.ShapeDtypeStruct((2, n, 1), jnp.float32),
        ],
        compiler_params=pltpu.CompilerParams(
            dimension_semantics=("parallel",),
            vmem_limit_bytes=32 * 1024 * 1024,
        ),
    )(emb_i, emb_j)

    two_n = 2 * n
    # (2, N, D) -> (2N, D) and (2, N, 1) -> (2N, 1): free row-major reshapes,
    # no HBM concat round trip.
    z = z_stacked.reshape(two_n, d)
    pos_full = pos_stacked.reshape(two_n, 1)

    # ---- tile selection for kernel 2 (v7x 64 MiB/TC VMEM in mind) -----------
    if two_n * d * 2 <= 8 * 1024 * 1024:
        tn = two_n  # whole bf16 Z column-resident: one DMA, no re-streaming
    else:
        tn_cap = max(16, min(2048, (4 * 1024 * 1024) // max(2 * d, 1)))
        tn = _pick_tile(two_n, tn_cap, align=16)

    tm = _pick_tile(two_n, 512, align=16)
    # bound the bf16 row block and the f32 (tm, tn) sim/exp temporaries
    while tm % 32 == 0 and (tm * d * 2 > 4 * 1024 * 1024
                            or tm * tn * 4 > 4 * 1024 * 1024):
        tm //= 2
    # v7x megacore: only the "parallel" row axis shards across its 2 TensorCores
    if two_n // tm < 2 and tm % 32 == 0:
        tm //= 2

    per_row = pl.pallas_call(
        functools.partial(_loss_kernel, inv_t=inv_t),
        grid=(two_n // tm, two_n // tn),
        in_specs=[
            pl.BlockSpec((tm, d), lambda i, j: (i, 0)),   # Z row tile
            pl.BlockSpec((tn, d), lambda i, j: (j, 0)),   # Z column tile
            pl.BlockSpec((tm, 1), lambda i, j: (i, 0)),   # positive logits
        ],
        out_specs=pl.BlockSpec((tm, 1), lambda i, j: (i, 0)),
        out_shape=jax.ShapeDtypeStruct((two_n, 1), jnp.float32),
        scratch_shapes=[pltpu.VMEM((tm, 1), jnp.float32)],   # row-sum accumulator
        compiler_params=pltpu.CompilerParams(
            dimension_semantics=("parallel", "arbitrary"),
            vmem_limit_bytes=48 * 1024 * 1024,
        ),
    )(z, z, pos_full)   # Z passed twice: row-tile view and column-tile view

    # Final mean over 2N rows (tiny; keeps the row grid axis purely "parallel").
    return jnp.sum(per_row) / jnp.float32(two_n)


def _reference_loss(emb_i, emb_j, temperature=0.5):
    # Pure-JAX transcription of the PyTorch forward, for verification.
    zi = emb_i / jnp.maximum(jnp.linalg.norm(emb_i, axis=1, keepdims=True), 1e-12)
    zj = emb_j / jnp.maximum(jnp.linalg.norm(emb_j, axis=1, keepdims=True), 1e-12)
    z = jnp.concatenate([zi, zj], axis=0)
    sim = z @ z.T
    n = emb_i.shape[0]
    e = jnp.exp(sim / temperature)
    denom = jnp.sum(e, axis=1) - jnp.diag(e)
    pos = jnp.concatenate([jnp.diag(sim[:n, n:]), jnp.diag(sim[n:, :n])])
    per_row = jnp.log(denom) - pos / temperature
    return jnp.mean(per_row)


if __name__ == "__main__":
    batch = 8      # batch_size in the module
    dim = 32       # embedding dim
    temperature = 0.5

    key = jax.random.PRNGKey(0)
    k1, k2 = jax.random.split(key)
    emb_i = jax.random.normal(k1, (batch, dim), dtype=jnp.float32)
    emb_j = jax.random.normal(k2, (batch, dim), dtype=jnp.float32)

    loss = contrastive_loss(emb_i, emb_j, temperature=temperature)
    loss = jax.block_until_ready(loss)

    ref = _reference_loss(emb_i, emb_j, temperature)
    # Z feeds the MXU in bf16 (intentional speed/precision trade-off); exp/log
    # and all accumulation stay f32, so only ~1e-3-level relative error remains.
    assert jnp.allclose(loss, ref, rtol=2e-2, atol=2e-2), (loss, ref)

    print("KERNEL_OK")
</pallas_src>

<mosaic_0001>
module attributes {stable_mosaic.version = 11 : i64} {
  func.func @_prep_kernel(%arg0: i32, %arg1: memref<8x32xf32, #tpu.memory_space<vmem>>, %arg2: memref<8x32xf32, #tpu.memory_space<vmem>>, %arg3: memref<2x8x32xbf16, #tpu.memory_space<vmem>>, %arg4: memref<2x8x1xf32, #tpu.memory_space<vmem>>) attributes {dimension_semantics = [#tpu.dimension_semantics<parallel>], iteration_bounds = array<i64: 1>, scalar_prefetch = 0 : i64, scratch_operands = 0 : i64, tpu.core_type = #tpu.core_type<tc>, window_params = [{transform_indices = @transform_0, window_bounds = array<i64: 8, 32>}, {transform_indices = @transform_1, window_bounds = array<i64: 8, 32>}, {transform_indices = @transform_2, window_bounds = array<i64: 2, 8, 32>}, {transform_indices = @transform_3, window_bounds = array<i64: 2, 8, 1>}]} {
    %c0 = arith.constant 0 : index
    %c0_0 = arith.constant 0 : index
    %0 = vector.load %arg1[%c0, %c0_0] : memref<8x32xf32, #tpu.memory_space<vmem>>, vector<8x32xf32>
    %c0_1 = arith.constant 0 : index
    %c0_2 = arith.constant 0 : index
    %1 = vector.load %arg2[%c0_1, %c0_2] : memref<8x32xf32, #tpu.memory_space<vmem>>, vector<8x32xf32>
    %2 = arith.mulf %0, %0 : vector<8x32xf32>
    %cst = arith.constant dense<0.000000e+00> : vector<8xf32>
    %3 = vector.multi_reduction <add>, %2, %cst [1] : vector<8x32xf32> to vector<8xf32>
    %4 = vector.shape_cast %3 : vector<8xf32> to vector<8x1xf32>
    %cst_3 = arith.constant 1.000000e-24 : f32
    %5 = vector.broadcast %cst_3 : f32 to vector<8x1xf32>
    %6 = arith.maximumf %4, %5 : vector<8x1xf32>
    %7 = math.rsqrt %6 : vector<8x1xf32>
    %cst_4 = arith.constant 1.41421354 : f32
    %8 = vector.broadcast %cst_4 : f32 to vector<8x1xf32>
    %9 = arith.mulf %7, %8 : vector<8x1xf32>
    %10 = vector.broadcast %9 : vector<8x1xf32> to vector<8x32xf32>
    %11 = arith.mulf %0, %10 : vector<8x32xf32>
    %12 = arith.mulf %1, %1 : vector<8x32xf32>
    %cst_5 = arith.constant dense<0.000000e+00> : vector<8xf32>
    %13 = vector.multi_reduction <add>, %12, %cst_5 [1] : vector<8x32xf32> to vector<8xf32>
    %14 = vector.shape_cast %13 : vector<8xf32> to vector<8x1xf32>
    %cst_6 = arith.constant 1.000000e-24 : f32
    %15 = vector.broadcast %cst_6 : f32 to vector<8x1xf32>
    %16 = arith.maximumf %14, %15 : vector<8x1xf32>
    %17 = math.rsqrt %16 : vector<8x1xf32>
    %cst_7 = arith.constant 1.41421354 : f32
    %18 = vector.broadcast %cst_7 : f32 to vector<8x1xf32>
    %19 = arith.mulf %17, %18 : vector<8x1xf32>
    %20 = vector.broadcast %19 : vector<8x1xf32> to vector<8x32xf32>
    %21 = arith.mulf %1, %20 : vector<8x32xf32>
    %22 = arith.mulf %11, %21 : vector<8x32xf32>
    %cst_8 = arith.constant dense<0.000000e+00> : vector<8xf32>
    %23 = vector.multi_reduction <add>, %22, %cst_8 [1] : vector<8x32xf32> to vector<8xf32>
    %24 = vector.shape_cast %23 : vector<8xf32> to vector<8x1xf32>
    %25 = arith.truncf %11 : vector<8x32xf32> to vector<8x32xbf16>
    %c0_9 = arith.constant 0 : index
    %c0_10 = arith.constant 0 : index
    %c0_11 = arith.constant 0 : index
    %26 = vector.load %arg3[%c0_9, %c0_10, %c0_11] : memref<2x8x32xbf16, #tpu.memory_space<vmem>>, vector<1x8x32xbf16>
    %27 = vector.shape_cast %26 : vector<1x8x32xbf16> to vector<8x32xbf16>
    %28 = vector.shape_cast %25 : vector<8x32xbf16> to vector<1x8x32xbf16>
    tpu.vector_store %arg3[%c0_9, %c0_10, %c0_11], %28 {strides = array<i32>} : memref<2x8x32xbf16, #tpu.memory_space<vmem>>, vector<1x8x32xbf16>,
    %29 = arith.truncf %21 : vector<8x32xf32> to vector<8x32xbf16>
    %c1 = arith.constant 1 : index
    %c0_12 = arith.constant 0 : index
    %c0_13 = arith.constant 0 : index
    %30 = vector.load %arg3[%c1, %c0_12, %c0_13] : memref<2x8x32xbf16, #tpu.memory_space<vmem>>, vector<1x8x32xbf16>
    %31 = vector.shape_cast %30 : vector<1x8x32xbf16> to vector<8x32xbf16>
    %32 = vector.shape_cast %29 : vector<8x32xbf16> to vector<1x8x32xbf16>
    tpu.vector_store %arg3[%c1, %c0_12, %c0_13], %32 {strides = array<i32>} : memref<2x8x32xbf16, #tpu.memory_space<vmem>>, vector<1x8x32xbf16>,
    %c0_14 = arith.constant 0 : index
    %c0_15 = arith.constant 0 : index
    %c0_16 = arith.constant 0 : index
    %33 = vector.load %arg4[%c0_14, %c0_15, %c0_16] : memref<2x8x1xf32, #tpu.memory_space<vmem>>, vector<1x8x1xf32>
    %34 = vector.shape_cast %33 : vector<1x8x1xf32> to vector<8x1xf32>
    %35 = vector.shape_cast %24 : vector<8x1xf32> to vector<1x8x1xf32>
    tpu.vector_store %arg4[%c0_14, %c0_15, %c0_16], %35 {strides = array<i32>} : memref<2x8x1xf32, #tpu.memory_space<vmem>>, vector<1x8x1xf32>,
    %c1_17 = arith.constant 1 : index
    %c0_18 = arith.constant 0 : index
    %c0_19 = arith.constant 0 : index
    %36 = vector.load %arg4[%c1_17, %c0_18, %c0_19] : memref<2x8x1xf32, #tpu.memory_space<vmem>>, vector<1x8x1xf32>
    %37 = vector.shape_cast %36 : vector<1x8x1xf32> to vector<8x1xf32>
    %38 = vector.shape_cast %24 : vector<8x1xf32> to vector<1x8x1xf32>
    tpu.vector_store %arg4[%c1_17, %c0_18, %c0_19], %38 {strides = array<i32>} : memref<2x8x1xf32, #tpu.memory_space<vmem>>, vector<1x8x1xf32>,
    return
  }
  func.func @transform_0(%arg0: i32) -> (i32, i32) {
    %c0_i32 = arith.constant 0 : i32
    %c0_i32_0 = arith.constant 0 : i32
    return %arg0, %c0_i32 : i32, i32
  }
  func.func @transform_1(%arg0: i32) -> (i32, i32) {
    %c0_i32 = arith.constant 0 : i32
    %c0_i32_0 = arith.constant 0 : i32
    return %arg0, %c0_i32 : i32, i32
  }
  func.func @transform_2(%arg0: i32) -> (i32, i32, i32) {
    %c0_i32 = arith.constant 0 : i32
    %c0_i32_0 = arith.constant 0 : i32
    %c0_i32_1 = arith.constant 0 : i32
    return %c0_i32, %arg0, %c0_i32_0 : i32, i32, i32
  }
  func.func @transform_3(%arg0: i32) -> (i32, i32, i32) {
    %c0_i32 = arith.constant 0 : i32
    %c0_i32_0 = arith.constant 0 : i32
    %c0_i32_1 = arith.constant 0 : i32
    return %c0_i32, %arg0, %c0_i32_0 : i32, i32, i32
  }
}

module attributes {stable_mosaic.version = 11 : i64} {
  func.func @_loss_kernel(%arg0: i32, %arg1: i32, %arg2: memref<16x32xbf16, #tpu.memory_space<vmem>>, %arg3: memref<16x32xbf16, #tpu.memory_space<vmem>>, %arg4: memref<16x1xf32, #tpu.memory_space<vmem>>, %arg5: memref<16x1xf32, #tpu.memory_space<vmem>>, %arg6: memref<16x1xf32, #tpu.memory_space<vmem>>) attributes {dimension_semantics = [#tpu.dimension_semantics<parallel>, #tpu.dimension_semantics<arbitrary>], iteration_bounds = array<i64: 1, 1>, scalar_prefetch = 0 : i64, scratch_operands = 1 : i64, tpu.core_type = #tpu.core_type<tc>, window_params = [{transform_indices = @transform_0, window_bounds = array<i64: 16, 32>}, {transform_indices = @transform_1, window_bounds = array<i64: 16, 32>}, {transform_indices = @transform_2, window_bounds = array<i64: 16, 1>}, {transform_indices = @transform_3, window_bounds = array<i64: 16, 1>}]} {
    %c0_i32 = arith.constant 0 : i32
    %0 = arith.cmpi eq, %arg1, %c0_i32 : i32
    %1 = arith.extui %0 : i1 to i32
    %c0_i32_0 = arith.constant 0 : i32
    %2 = arith.cmpi ne, %1, %c0_i32_0 : i32
    scf.if %2 {
      %cst_12 = arith.constant 0.000000e+00 : f32
      %17 = vector.broadcast %cst_12 : f32 to vector<16x1xf32>
      %c0_13 = arith.constant 0 : index
      %c0_14 = arith.constant 0 : index
      %18 = vector.load %arg6[%c0_13, %c0_14] : memref<16x1xf32, #tpu.memory_space<vmem>>, vector<16x1xf32>
      tpu.vector_store %arg6[%c0_13, %c0_14], %17 {strides = array<i32>} : memref<16x1xf32, #tpu.memory_space<vmem>>, vector<16x1xf32>,
    } else {
    }
    %c0 = arith.constant 0 : index
    %c0_1 = arith.constant 0 : index
    %3 = vector.load %arg2[%c0, %c0_1] : memref<16x32xbf16, #tpu.memory_space<vmem>>, vector<16x32xbf16>
    %c0_2 = arith.constant 0 : index
    %c0_3 = arith.constant 0 : index
    %4 = vector.load %arg3[%c0_2, %c0_3] : memref<16x32xbf16, #tpu.memory_space<vmem>>, vector<16x32xbf16>
    %cst = arith.constant dense<0.000000e+00> : vector<16x16xf32>
    %5 = tpu.matmul %3, %4, %cst {dimension_numbers = #tpu.dot_dimension_numbers<[1], [1], [0], [0], [0, 0, 1, 0], [], []>} : vector<16x32xbf16>, vector<16x32xbf16>, vector<16x16xf32> -> vector<16x16xf32>
    %c0_4 = arith.constant 0 : index
    %c0_5 = arith.constant 0 : index
    %6 = vector.load %arg6[%c0_4, %c0_5] : memref<16x1xf32, #tpu.memory_space<vmem>>, vector<16x1xf32>
    %cst_6 = arith.constant 2.000000e+00 : f32
    %7 = vector.broadcast %cst_6 : f32 to vector<16x16xf32>
    %8 = arith.subf %5, %7 : vector<16x16xf32>
    %9 = math.exp %8 : vector<16x16xf32>
    %cst_7 = arith.constant dense<0.000000e+00> : vector<16xf32>
    %10 = vector.multi_reduction <add>, %9, %cst_7 [1] : vector<16x16xf32> to vector<16xf32>
    %11 = vector.shape_cast %10 : vector<16xf32> to vector<16x1xf32>
    %12 = arith.addf %6, %11 : vector<16x1xf32>
    %c0_8 = arith.constant 0 : index
    %c0_9 = arith.constant 0 : index
    %13 = vector.load %arg6[%c0_8, %c0_9] : memref<16x1xf32, #tpu.memory_space<vmem>>, vector<16x1xf32>
    tpu.vector_store %arg6[%c0_8, %c0_9], %12 {strides = array<i32>} : memref<16x1xf32, #tpu.memory_space<vmem>>, vector<16x1xf32>,
    %c0_i32_10 = arith.constant 0 : i32
    %14 = arith.cmpi eq, %arg1, %c0_i32_10 : i32
    %15 = arith.extui %14 : i1 to i32
    %c0_i32_11 = arith.constant 0 : i32
    %16 = arith.cmpi ne, %15, %c0_i32_11 : i32
    scf.if %16 {
      %c0_12 = arith.constant 0 : index
      %c0_13 = arith.constant 0 : index
      %17 = vector.load %arg6[%c0_12, %c0_13] : memref<16x1xf32, #tpu.memory_space<vmem>>, vector<16x1xf32>
      %cst_14 = arith.constant 1.000000e+00 : f32
      %18 = vector.broadcast %cst_14 : f32 to vector<16x1xf32>
      %19 = arith.subf %17, %18 : vector<16x1xf32>
      %cst_15 = arith.constant 1.000000e-30 : f32
      %20 = vector.broadcast %cst_15 : f32 to vector<16x1xf32>
      %21 = arith.maximumf %19, %20 : vector<16x1xf32>
      %22 = math.log %21 : vector<16x1xf32>
      %cst_16 = arith.constant 2.000000e+00 : f32
      %23 = vector.broadcast %cst_16 : f32 to vector<16x1xf32>
      %24 = arith.addf %23, %22 : vector<16x1xf32>
      %c0_17 = arith.constant 0 : index
      %c0_18 = arith.constant 0 : index
      %25 = vector.load %arg4[%c0_17, %c0_18] : memref<16x1xf32, #tpu.memory_space<vmem>>, vector<16x1xf32>
      %26 = arith.subf %24, %25 : vector<16x1xf32>
      %c0_19 = arith.constant 0 : index
      %c0_20 = arith.constant 0 : index
      %27 = vector.load %arg5[%c0_19, %c0_20] : memref<16x1xf32, #tpu.memory_space<vmem>>, vector<16x1xf32>
      tpu.vector_store %arg5[%c0_19, %c0_20], %26 {strides = array<i32>} : memref<16x1xf32, #tpu.memory_space<vmem>>, vector<16x1xf32>,
    } else {
    }
    return
  }
  func.func @transform_0(%arg0: i32, %arg1: i32) -> (i32, i32) {
    %c0_i32 = arith.constant 0 : i32
    %c0_i32_0 = arith.constant 0 : i32
    return %arg0, %c0_i32 : i32, i32
  }
  func.func @transform_1(%arg0: i32, %arg1: i32) -> (i32, i32) {
    %c0_i32 = arith.constant 0 : i32
    %c0_i32_0 = arith.constant 0 : i32
    return %arg1, %c0_i32 : i32, i32
  }
  func.func @transform_2(%arg0: i32, %arg1: i32) -> (i32, i32) {
    %c0_i32 = arith.constant 0 : i32
    %c0_i32_0 = arith.constant 0 : i32
    return %arg0, %c0_i32 : i32, i32
  }
  func.func @transform_3(%arg0: i32, %arg1: i32) -> (i32, i32) {
    %c0_i32 = arith.constant 0 : i32
    %c0_i32_0 = arith.constant 0 : i32
    return %arg0, %c0_i32 : i32, i32
  }
}

</mosaic_0001>

<bundles_post_ra>
// kernel: contrastive_loss.3
= control target key start
LH: loop header
LB: loop body
LE: loop exit
PB: predicated region body
PF: predicated region fallthrough
CT: control target
= control target key end

     0   :  { %vm19_vm0 = vcmask 7168   ;;  %vm36_vm1 = vcmask 261120   ;;  %v156_v0 = vmov 0.0   ;;  %vm157_vm2 = vmmov 0   ;;  %s202_s1 = inlined_call_operand.vmem [shape: bf16[16,32], index: 1, kind: input, shape index: {}, may-alias: {0,1}]   ;;  %s203_s0 = inlined_call_operand.vmem [shape: bf16[16,32], index: 0, kind: input, shape index: {}, may-alias: {0,1}]   ;;  %s204_s2 = inlined_call_operand.vmem [shape: f32[16,1], index: 2, kind: input, shape index: {}]   ;;  %s205_s3 = inlined_call_operand.vmem [shape: f32[16,1], index: 3, kind: output, shape index: {}]  }
   0x1   :  { %20 = vst.msk [vmem:[#allocation2] sm:$0xff] %vm19_vm0, %v156_v0  ;;  %21 = vst.msk [vmem:[#allocation2 + $0x8] sm:$0xff] %vm19_vm0, %v156_v0  ;;  %138 = vmatprep.subr.bf16.mxu0 %v156_v0  ;;  %v146_v1 = vld [vmem:[%s202_s1] sm:$0xff]   ;;  %140 = vmatprep.mubr.msk.bf16.mxu0 %vm157_vm2, %v156_v0  ;;  %vm92_vm3 = vcmask 130048   ;;  %v120_v35 = vld [vmem:[%s204_s2 + $0x8] sm:$0xff] }
   0x2   :  { %v41_v2 = vsel %vm36_vm1, %v146_v1, 0  ;;  %v147_v3 = vld [vmem:[%s203_s0] sm:$0xff]  }
   0x3   :  { %139 = vmatpush3.bf16.xpose.msra.mxu0 %v41_v2  ;;  %v119_v30 = vld [vmem:[%s204_s2] sm:$0xff] }
   0x8   :  { %v84_v16 = vld [vmem:[#allocation2] sm:$0xff]  ;;  %v85_v19 = vld [vmem:[#allocation2 + $0x8] sm:$0xff] }
   0xa   :  { %141 = vmatmul.mubr.msk.bf16.vlgmr.msra.gmra.mrb[0].mxu0 %vm36_vm1, %v147_v3 }
  0xdd   :  { %v77_v4 = vpop.f32.mrb[0].mxu0 }
  0xde   :  { %v132_v5 = vadd.f32 -2.0, %v77_v4  ;;  %v142_v6 = vpop.f32.mrb[1].mxu0 }
  0xdf   :  { %v80_v7 = vpop.f32.mrb[2].mxu0 }
  0xe0   :  { %v88_v8 = vmul.f32 1.442695, %v132_v5  ;;  %v133_v9 = vadd.f32 -2.0, %v80_v7  ;;  %v143_v10 = vpop.f32.mrb[3].mxu0 }
  0xe2   :  { %148 = vpow2.f32 %v88_v8  ;;  %v90_v11 = vmul.f32 1.442695, %v133_v9 }
  0xe4   :  { %150 = vpow2.f32 %v90_v11 }
  0xec   :  { %v149_v12 = vpop.eup %148 }
  0xed   :  { %v93_v13 = vsel %vm92_vm3, %v149_v12, 0.0 }
  0xee   :  { %v151_v14 = vpop.eup %150  ;;  %94 = vadd.xlane.f32.xlu0 %v93_v13 }
  0xef   :  { %v96_v15 = vsel %vm92_vm3, %v151_v14, 0.0 }
  0xf2   :  { %97 = vadd.xlane.f32.xlu0 %v96_v15 }
 0x17b   :  { %v95_v17 = vpop.xlane.xlu0 %94 }
 0x17c   :  { %v99_v18 = vadd.f32 %v95_v17, %v84_v16 }
 0x17e   :  { %102 = vst.msk [vmem:[#allocation2] sm:$0xff] %vm19_vm0, %v99_v18 }
 0x17f   :  { %v98_v20 = vpop.xlane.xlu0 %97 }
 0x180   :  { %v100_v21 = vadd.f32 %v98_v20, %v85_v19 }
 0x182   :  { %103 = vst.msk [vmem:[#allocation2 + $0x8] sm:$0xff] %vm19_vm0, %v100_v21 }
 0x185   :  { %v107_v22 = vld [vmem:[#allocation2] sm:$0xff] }
 0x186   :  { %v134_v23 = vadd.f32 -1.0, %v107_v22 }
 0x188   :  { %v111_v24 = vmax.f32 %v134_v23, 1e-30 }
 0x189   :  { %v108_v25 = vld [vmem:[#allocation2 + $0x8] sm:$0xff] }
 0x18a   :  { %152 = vlog2.f32 %v111_v24  ;;  %v135_v26 = vadd.f32 -1.0, %v108_v25 }
 0x18c   :  { %v112_v27 = vmax.f32 %v135_v26, 1e-30 }
 0x18e   :  { %154 = vlog2.f32 %v112_v27 }
 0x194   :  { %v153_v28 = vpop.eup %152 }
 0x195   :  { %v114_v29 = vmul.f32 0.6931472, %v153_v28 }
 0x197   :  { %v117_v31 = vadd.f32 2.0, %v114_v29 }
 0x198   :  { %v155_v32 = vpop.eup %154 }
 0x199   :  { %v121_v33 = vsub.f32 %v117_v31, %v119_v30  ;;  %v116_v34 = vmul.f32 0.6931472, %v155_v32 }
 0x19b   :  { %123 = vst.msk [vmem:[%s205_s3] sm:$0xff] %vm19_vm0, %v121_v33  ;;  %v118_v36 = vadd.f32 2.0, %v116_v34 }
 0x19d   :  { %v122_v37 = vsub.f32 %v118_v36, %v120_v35 }
 0x19f   :  { %124 = vst.msk [vmem:[%s205_s3 + $0x8] sm:$0xff] %vm19_vm0, %v122_v37 }

// kernel: contrastive_loss.2
= control target key start
LH: loop header
LB: loop body
LE: loop exit
PB: predicated region body
PF: predicated region fallthrough
CT: control target
= control target key end

     0   :  { %9 = vsyncpa [#allocation3], 0  ;;  %s197_s0 = inlined_call_operand.hbm [shape: f32[8,32], index: 0, kind: input, shape index: {}]   ;;  %s198_s1 = inlined_call_operand.hbm [shape: f32[8,32], index: 1, kind: input, shape index: {}]   ;;  %s199_s2 = inlined_call_operand.vmem [shape: bf16[2,8,32], index: 2, kind: output, shape index: {0}]   ;;  %s200_s3 = inlined_call_operand.vmem [shape: f32[2,8,1], index: 3, kind: output, shape index: {1}]  }
   0x1   :  { %10 = vsyncpa [#allocation5], 0  ;;  %s136_s12 = smov [#allocation2]   ;;  %s137_s14 = smov [#allocation4]  }
   0x2   :  { %s17_s13 = sshll.u32 %s136_s12, 4  ;;  %s27_s15 = sshll.u32 %s137_s14, 4  ;;  %s18_s13 = int_to_ptr.vmem [resolvable:$true] %s17_s13  ;;  %s28_s15 = int_to_ptr.vmem [resolvable:$true] %s27_s15 }
   0x3   :  { %s88_s18 = scalar_lea.hbm %s197_s0, 128 }
   0x4   :  { %p89_p0 = scmp.ne.s32.totalorder %s197_s0, %s88_s18  ;;  %p92_p1 = scmp.lt.u32.totalorder %s88_s18, %s197_s0 }
   0x6   :  { %p94_p2 = pnand %p92_p1, %p89_p0 }
   0x8   :  { %97 = shalt.err (!%p94_p2)
}
   0x9   :  { %s98_s23 = scalar_lea.vmem %s18_s13, 128  ;;  %p103_p4 = scmp.lt.s32.totalorder %s18_s13, %s18_s13 }
   0xa   :  { %p99_p3 = scmp.ne.s32.totalorder %s18_s13, %s98_s23  ;;  %p104_p5 = scmp.lt.s32.totalorder %s98_s23, %s98_s23 }
   0xc   :  { %p105_p6 = por %p104_p5, %p103_p4 }
   0xe   :  { %p106_p7 = pnand %p105_p6, %p99_p3 }
  0x10   :  { %109 = shalt.err (!%p106_p7)
}
  0x11   :  { %20 = dma.hbm_to_vmem [thread:$0]  %s197_s0, 128, %s18_s13, [#allocation3]  }
  0x12   :  { %s110_s28 = scalar_lea.hbm %s198_s1, 128 }
  0x13   :  { %p111_p8 = scmp.ne.s32.totalorder %s198_s1, %s110_s28  ;;  %p114_p9 = scmp.lt.u32.totalorder %s110_s28, %s198_s1 }
  0x15   :  { %p116_p10 = pnand %p114_p9, %p111_p8 }
  0x17   :  { %119 = shalt.err (!%p116_p10)
}
  0x18   :  { %s120_s6 = scalar_lea.vmem %s28_s15, 128  ;;  %p125_p12 = scmp.lt.s32.totalorder %s28_s15, %s28_s15 }
  0x19   :  { %p121_p11 = scmp.ne.s32.totalorder %s28_s15, %s120_s6  ;;  %p126_p13 = scmp.lt.s32.totalorder %s120_s6, %s120_s6 }
  0x1b   :  { %p127_p0 = por %p126_p13, %p125_p12 }
  0x1d   :  { %p128_p1 = pnand %p127_p0, %p121_p11 }
  0x1f   :  { %131 = shalt.err (!%p128_p1)
}
  0x20   :  { %30 = dma.hbm_to_vmem [thread:$0]  %s198_s1, 128, %s28_s15, [#allocation5]  }
  0x21   :  { %132 = dma.done.wait [#allocation3], 128  }
  0x22   :  { %133 = vsyncadd [#allocation3], 4294967168 }
  0x23   :  { %134 = dma.done.wait [#allocation5], 128  }
  0x24   :  { %135 = vsyncadd [#allocation5], 4294967168  ;;  %v37_v0 = vld [vmem:[#allocation2] sm:$0xff]  ;;  %vm40_vm0 = vcmask 261120   ;;  %v38_v1 = vld [vmem:[#allocation4] sm:$0xff]  ;;  %vm61_vm1 = vcmask 257024  }
  0x25   :  { %v39_v2 = vmul.f32 %v37_v0, %v37_v0  ;;  %v48_v3 = vmul.f32 %v38_v1, %v38_v1  ;;  %vm66_vm2 = vcmask 7168  }
  0x27   :  { %v41_v4 = vsel %vm40_vm0, %v39_v2, 0.0  ;;  %v49_v5 = vsel %vm40_vm0, %v48_v3, 0.0 }
  0x28   :  { %42 = vadd.xlane.f32.xlu0 %v41_v4 }
  0x2c   :  { %50 = vadd.xlane.f32.xlu0 %v49_v5 }
  0xb5   :  { %v43_v6 = vpop.xlane.xlu0 %42 }
  0xb6   :  { %v44_v7 = vmax.f32 %v43_v6, 1e-24 }
  0xb8   :  { %84 = vrsqrt.f32 %v44_v7 }
  0xb9   :  { %v51_v8 = vpop.xlane.xlu0 %50 }
  0xba   :  { %v52_v9 = vmax.f32 %v51_v8, 1e-24 }
  0xbc   :  { %86 = vrsqrt.f32 %v52_v9 }
  0xc2   :  { %v85_v10 = vpop.eup %84 }
  0xc3   :  { %v46_v11 = vmul.f32 1.4142135, %v85_v10 }
  0xc5   :  { %v47_v12 = vmul.f32 %v46_v11, %v37_v0 }
  0xc6   :  { %v87_v13 = vpop.eup %86 }
  0xc7   :  { %v54_v14 = vmul.f32 1.4142135, %v87_v13  ;;  %v60_v15 = vpack.c.bf16 %v47_v12, %v47_v12 }
  0xc9   :  { %v55_v16 = vmul.f32 %v54_v14, %v38_v1  ;;  %62 = vst.msk [vmem:[%s199_s2] sm:$0xf] %vm61_vm1, %v60_v15 }
  0xcb   :  { %v56_v17 = vmul.f32 %v55_v16, %v47_v12  ;;  %v63_v18 = vpack.c.bf16 %v55_v16, %v55_v16 }
  0xcd   :  { %v57_v19 = vsel %vm40_vm0, %v56_v17, 0.0  ;;  %80 = vst.msk [vmem:[%s199_s2 + $0x4] sm:$0xf] %vm61_vm1, %v63_v18 }
  0xce   :  { %58 = vadd.xlane.f32.xlu1 %v57_v19 }
 0x15b   :  { %v59_v20 = vpop.xlane.xlu1 %58 }
 0x15c   :  { %67 = vst.msk [vmem:[%s200_s3] sm:$0xff] %vm66_vm2, %v59_v20  ;;  %81 = vst.msk [vmem:[%s200_s3 + $0x8] sm:$0xff] %vm66_vm2, %v59_v20 }
 0x15d   :  { %78 = vsyncpa [#allocation3], 1 }
 0x15e   :  { %79 = vsyncpa [#allocation5], 1 }

</bundles_post_ra>
